<compile_context>
chip_gen: v6e
topology: v6e:2x2x1
jax: 0.10.0
libtpu: 0.0.40
codegen_flags: <defaults>
</compile_context>

<pallas_src>
import functools

import jax
import jax.numpy as jnp
from jax.experimental import pallas as pl
from jax.experimental.pallas import tpu as pltpu


# ----------------------------------------------------------------------------
# Hardware / tiling helpers
# ----------------------------------------------------------------------------

def _tc_per_chip():
    """TensorCores addressable by one JAX device (grid 'parallel' width)."""
    try:
        kind = jax.devices()[0].device_kind.lower()
    except Exception:
        return 1
    if "v7" in kind or "7x" in kind:
        return 2          # v7x: 2 TCs per chip -> 2-way parallel batch grid
    if "v4" in kind or "v5p" in kind:
        return 2          # megacore generations
    return 1              # v2/v3/v5e/v6e: 1 TC -> single grid step


def _grid_steps(n):
    """Largest divisor of the batch that is <= the number of TensorCores."""
    s = min(n, _tc_per_chip())
    while s > 1 and n % s != 0:
        s -= 1
    return max(s, 1)


def _spatial_tile(hw, max_lanes=32768):
    """Largest lane-dense (multiple-of-128) tile of the flattened spatial axis
    that divides it, capped at max_lanes; full axis if it already fits."""
    if hw <= max_lanes:
        return hw
    if hw % 128 != 0:
        # TODO(synk): pad the flattened spatial axis to a multiple of 128 for
        # odd shapes instead of falling back to a full (possibly masked) block.
        return hw
    t = max_lanes - (max_lanes % 128)
    while t > 128 and hw % t != 0:
        t -= 128
    return max(t, 128)


# ----------------------------------------------------------------------------
# Pallas kernels
# ----------------------------------------------------------------------------

def _conv1x1_kernel(x_ref, w_ref, b_ref, o_ref):
    # x_ref: (NB, Cin, TS) VMEM     w_ref: (Cout, Cin) VMEM f32
    # b_ref: (Cout, 1) VMEM f32     o_ref: (NB, Cout, TS) VMEM
    nb, cin, ts = x_ref.shape
    cout = o_ref.shape[1]
    w = w_ref[...]                                    # tiny VMEM weight tile
    b = b_ref[...]                                    # (Cout, 1)
    for n in range(nb):                               # static, tiny batch block
        x = x_ref[n].astype(jnp.float32)              # (Cin, TS) lane-dense
        acc = jnp.zeros((cout, ts), jnp.float32)      # Cout on sublanes
        for ci in range(cin):
            # (Cout,1) weight column x (1,TS) tap -> (Cout,TS) VPU FMA.
            acc = acc + w[:, ci:ci + 1] * x[ci:ci + 1, :]
        o_ref[n] = (acc + b).astype(o_ref.dtype)      # bias added once


def _conv3x3_kernel(x_ref, w_ref, b_ref, o_ref, *, H, W):
    # x_ref: (NB, Cin, H*W) VMEM    w_ref: (Cout, Cin*9) VMEM f32
    # b_ref: (Cout, 1) VMEM f32     o_ref: (NB, Cout, H*W) VMEM
    # 'same' 3x3 conv as 9 lane-rotations (XLU) + masked VPU FMAs; halo masks
    # are generated in-kernel from a lane iota (no (9,HW) mask DMA), and the
    # center tap is not masked at all.
    nb, cin, hw = x_ref.shape
    cout = o_ref.shape[1]
    w = w_ref[...]                                    # (Cout, Cin*9)
    b = b_ref[...]                                    # (Cout, 1)

    lane_i = jax.lax.broadcasted_iota(jnp.int32, (1, hw), 1)
    lane_f = lane_i.astype(jnp.float32)
    col_f = lane_f - jnp.floor(lane_f / W) * W        # exact for these sizes
    not_top = lane_i >= W                             # row >= 1
    not_bot = lane_i < (H - 1) * W                    # row <= H-2
    not_left = col_f >= 0.5                           # col >= 1
    not_right = col_f <= (W - 1.5)                    # col <= W-2

    for n in range(nb):                               # static, tiny batch block
        x = x_ref[n].astype(jnp.float32)              # (Cin, HW)
        acc = jnp.zeros((cout, hw), jnp.float32)      # Cout on sublanes
        k = 0
        for dy in (-1, 0, 1):
            for dx in (-1, 0, 1):
                shift = (-(dy * W + dx)) % hw
                rolled = x if shift == 0 else pltpu.roll(x, shift=shift, axis=1)
                cond = None
                if dy == -1:
                    cond = not_top
                elif dy == 1:
                    cond = not_bot
                if dx == -1:
                    cond = not_left if cond is None else (cond & not_left)
                elif dx == 1:
                    cond = not_right if cond is None else (cond & not_right)
                tap = rolled if cond is None else jnp.where(cond, rolled, 0.0)
                for ci in range(cin):
                    j = ci * 9 + k
                    acc = acc + w[:, j:j + 1] * tap[ci:ci + 1, :]
                k += 1
        o_ref[n] = (acc + b).astype(o_ref.dtype)


# ----------------------------------------------------------------------------
# Wrappers (layout / BlockSpec plumbing)
# ----------------------------------------------------------------------------

@jax.jit
def conv1x1_nchw(x, w, b):
    # x: (N, Cin, H, W)   w: (Cout, Cin)   b: (Cout,)
    N, Cin, H, W = x.shape
    Cout = w.shape[0]
    HW = H * W
    x3 = x.reshape(N, Cin, HW)                        # metadata-only reshape
    steps = _grid_steps(N)
    NB = N // steps
    TS = _spatial_tile(HW)
    n_sp = HW // TS
    wf = w.astype(jnp.float32)                        # (Cout, Cin) VMEM tile
    bf = b.astype(jnp.float32).reshape(Cout, 1)       # (Cout, 1)  VMEM tile

    if n_sp == 1:                                     # no degenerate grid axis
        grid = (steps,)
        idx_x = lambda n: (n, 0, 0)
        idx_w = lambda n: (0, 0)
        sems = ("parallel",)
    else:
        grid = (steps, n_sp)
        idx_x = lambda n, s: (n, 0, s)
        idx_w = lambda n, s: (0, 0)
        sems = ("parallel", "parallel")

    out = pl.pallas_call(
        _conv1x1_kernel,
        out_shape=jax.ShapeDtypeStruct((N, Cout, HW), x.dtype),
        grid_spec=pltpu.PrefetchScalarGridSpec(
            num_scalar_prefetch=0,
            grid=grid,
            in_specs=[
                pl.BlockSpec((NB, Cin, TS), idx_x),
                pl.BlockSpec((Cout, Cin), idx_w),
                pl.BlockSpec((Cout, 1), idx_w),
            ],
            out_specs=pl.BlockSpec((NB, Cout, TS), idx_x),
        ),
        compiler_params=pltpu.CompilerParams(
            dimension_semantics=sems,
            vmem_limit_bytes=32 * 1024 * 1024,        # safe on v5e/v6e/v7x
        ),
        cost_estimate=pl.CostEstimate(
            flops=2 * N * HW * Cin * Cout,
            transcendentals=0,
            bytes_accessed=x.dtype.itemsize * (N * Cin * HW + N * Cout * HW)
                           + 4 * (Cout * Cin + Cout),
        ),
    )(x3, wf, bf)
    return out.reshape(N, Cout, H, W)


@jax.jit
def conv3x3_nchw(x, w, b):
    # x: (N, Cin, H, W)   w: (Cout, Cin, 3, 3)   b: (Cout,)
    N, Cin, H, W = x.shape
    Cout = w.shape[0]
    HW = H * W
    x3 = x.reshape(N, Cin, HW)                        # metadata-only reshape
    steps = _grid_steps(N)
    NB = N // steps

    # Gate the untiled HW block on a conservative VMEM budget (v7x: 64 MiB
    # physical / 32 MiB scoped).  Input + output, double-buffered.
    block_bytes = 2 * NB * (Cin + Cout) * HW * max(x.dtype.itemsize, 4)
    if block_bytes > 24 * 1024 * 1024:
        # TODO(synk): tile H into row blocks with a +/-1-row halo for very
        # large images instead of an untiled spatial block.
        raise NotImplementedError("conv3x3_nchw: image too large for untiled VMEM block")

    # (Cout, Cin, 3, 3) -> (Cout, Cin*9) VMEM tile; column index = ci*9 + tap.
    wf = w.astype(jnp.float32).reshape(Cout, Cin * 9)
    bf = b.astype(jnp.float32).reshape(Cout, 1)
    kernel = functools.partial(_conv3x3_kernel, H=H, W=W)

    out = pl.pallas_call(
        kernel,
        out_shape=jax.ShapeDtypeStruct((N, Cout, HW), x.dtype),
        grid_spec=pltpu.PrefetchScalarGridSpec(
            num_scalar_prefetch=0,
            grid=(steps,),
            in_specs=[
                pl.BlockSpec((NB, Cin, HW), lambda n: (n, 0, 0)),
                pl.BlockSpec((Cout, Cin * 9), lambda n: (0, 0)),
                pl.BlockSpec((Cout, 1), lambda n: (0, 0)),
            ],
            out_specs=pl.BlockSpec((NB, Cout, HW), lambda n: (n, 0, 0)),
        ),
        compiler_params=pltpu.CompilerParams(
            dimension_semantics=("parallel",),
            vmem_limit_bytes=32 * 1024 * 1024,
        ),
        cost_estimate=pl.CostEstimate(
            flops=2 * 9 * N * HW * Cin * Cout,
            transcendentals=0,
            bytes_accessed=x.dtype.itemsize * (N * Cin * HW + N * Cout * HW)
                           + 4 * (9 * Cout * Cin + Cout),
        ),
    )(x3, wf, bf)
    return out.reshape(N, Cout, H, W)


# ----------------------------------------------------------------------------
# Candidate ops (deterministic parameter init, PyTorch NCHW / OIHW layouts)
# ----------------------------------------------------------------------------

class Conv1x1Op:
    def __init__(self, cin=4, cout=4, seed=1):
        k = jax.random.PRNGKey(seed)
        kw, kb = jax.random.split(k)
        self.w = jax.random.normal(kw, (cout, cin), jnp.float32) * 0.1
        self.b = jax.random.normal(kb, (cout,), jnp.float32) * 0.01

    def __call__(self, x_nchw):
        return conv1x1_nchw(x_nchw, self.w, self.b)


class Conv3x3Op:
    def __init__(self, cin=4, cout=4, seed=2):
        k = jax.random.PRNGKey(seed)
        kw, kb = jax.random.split(k)
        self.w = jax.random.normal(kw, (cout, cin, 3, 3), jnp.float32) * 0.1
        self.b = jax.random.normal(kb, (cout,), jnp.float32) * 0.01

    def __call__(self, x_nchw):
        return conv3x3_nchw(x_nchw, self.w, self.b)


class IdentityOp:
    def __call__(self, x_nchw):
        # Optimal identity is a pass-through (a copy kernel is pure HBM traffic).
        return x_nchw


# ----------------------------------------------------------------------------
# SelectOp: faithful port of the PyTorch module's forward semantics
# ----------------------------------------------------------------------------

class SelectOp:
    def __init__(self, *candidate_ops, count=False):
        self.ops = [op() for op in candidate_ops]
        self.counter = None
        self.current_option = None
        if count:
            self.counter = [0 for _ in self.ops]

    def __call__(self, *x, **kwargs):
        if self.counter is not None:
            self.counter[self.current_option] += 1
        return self.ops[self.current_option](*x, **kwargs)


# ----------------------------------------------------------------------------
# Main
# ----------------------------------------------------------------------------

if __name__ == "__main__":
    N, C, H, W = 2, 4, 16, 16
    key = jax.random.PRNGKey(0)
    x = jax.random.normal(key, (N, C, H, W), jnp.float32)   # PyTorch NCHW layout

    select = SelectOp(Conv1x1Op, Conv3x3Op, IdentityOp, count=True)

    # Exercise each candidate path once (as the SPOS supernet sampler would).
    outs = []
    for opt in range(len(select.ops)):
        select.current_option = opt
        outs.append(select(x))
    for o in outs:
        jax.block_until_ready(o)

    # Sanity checks vs. plain-JAX references.
    op1 = select.ops[0]
    ref1 = jnp.einsum("nchw,oc->nohw", x, op1.w) + op1.b.reshape(1, -1, 1, 1)
    assert jnp.allclose(outs[0], ref1, atol=1e-5, rtol=1e-5)

    op3 = select.ops[1]
    ref3 = jax.lax.conv_general_dilated(
        x, op3.w, (1, 1), "SAME",
        dimension_numbers=("NCHW", "OIHW", "NCHW")) + op3.b.reshape(1, -1, 1, 1)
    assert jnp.allclose(outs[1], ref3, atol=1e-4, rtol=1e-4)

    assert jnp.allclose(outs[2], x)
    assert select.counter == [1, 1, 1]

    print("KERNEL_OK")
</pallas_src>

<mosaic_0001>
module attributes {stable_mosaic.version = 11 : i64} {
  func.func @_conv1x1_kernel(%arg0: i32, %arg1: memref<2x4x256xf32, #tpu.memory_space<vmem>>, %arg2: memref<4x4xf32, #tpu.memory_space<vmem>>, %arg3: memref<4x1xf32, #tpu.memory_space<vmem>>, %arg4: memref<2x4x256xf32, #tpu.memory_space<vmem>>) attributes {dimension_semantics = [#tpu.dimension_semantics<parallel>], iteration_bounds = array<i64: 1>, scalar_prefetch = 0 : i64, scratch_operands = 0 : i64, tpu.core_type = #tpu.core_type<tc>, window_params = [{transform_indices = @transform_0, window_bounds = array<i64: 2, 4, 256>}, {pipeline_mode = #tpu.pipeline_mode<synchronous>, transform_indices = @transform_1, window_bounds = array<i64: 4, 4>}, {pipeline_mode = #tpu.pipeline_mode<synchronous>, transform_indices = @transform_2, window_bounds = array<i64: 4, 1>}, {transform_indices = @transform_3, window_bounds = array<i64: 2, 4, 256>}]} {
    %c0 = arith.constant 0 : index
    %c0_0 = arith.constant 0 : index
    %0 = vector.load %arg2[%c0, %c0_0] : memref<4x4xf32, #tpu.memory_space<vmem>>, vector<4x4xf32>
    %c0_1 = arith.constant 0 : index
    %c0_2 = arith.constant 0 : index
    %1 = vector.load %arg3[%c0_1, %c0_2] : memref<4x1xf32, #tpu.memory_space<vmem>>, vector<4x1xf32>
    %c0_3 = arith.constant 0 : index
    %c0_4 = arith.constant 0 : index
    %c0_5 = arith.constant 0 : index
    %2 = vector.load %arg1[%c0_3, %c0_4, %c0_5] : memref<2x4x256xf32, #tpu.memory_space<vmem>>, vector<1x4x256xf32>
    %3 = vector.shape_cast %2 : vector<1x4x256xf32> to vector<4x256xf32>
    %cst = arith.constant 0.000000e+00 : f32
    %4 = vector.broadcast %cst : f32 to vector<4x256xf32>
    %5 = vector.extract_strided_slice %0 {offsets = [0, 0], sizes = [4, 1], strides = [1, 1]} : vector<4x4xf32> to vector<4x1xf32>
    %6 = vector.extract_strided_slice %3 {offsets = [0, 0], sizes = [1, 256], strides = [1, 1]} : vector<4x256xf32> to vector<1x256xf32>
    %7 = vector.broadcast %5 : vector<4x1xf32> to vector<4x256xf32>
    %8 = vector.broadcast %6 : vector<1x256xf32> to vector<4x256xf32>
    %9 = arith.mulf %7, %8 : vector<4x256xf32>
    %10 = arith.addf %4, %9 : vector<4x256xf32>
    %11 = vector.extract_strided_slice %0 {offsets = [0, 1], sizes = [4, 1], strides = [1, 1]} : vector<4x4xf32> to vector<4x1xf32>
    %12 = vector.extract_strided_slice %3 {offsets = [1, 0], sizes = [1, 256], strides = [1, 1]} : vector<4x256xf32> to vector<1x256xf32>
    %13 = vector.broadcast %11 : vector<4x1xf32> to vector<4x256xf32>
    %14 = vector.broadcast %12 : vector<1x256xf32> to vector<4x256xf32>
    %15 = arith.mulf %13, %14 : vector<4x256xf32>
    %16 = arith.addf %10, %15 : vector<4x256xf32>
    %17 = vector.extract_strided_slice %0 {offsets = [0, 2], sizes = [4, 1], strides = [1, 1]} : vector<4x4xf32> to vector<4x1xf32>
    %18 = vector.extract_strided_slice %3 {offsets = [2, 0], sizes = [1, 256], strides = [1, 1]} : vector<4x256xf32> to vector<1x256xf32>
    %19 = vector.broadcast %17 : vector<4x1xf32> to vector<4x256xf32>
    %20 = vector.broadcast %18 : vector<1x256xf32> to vector<4x256xf32>
    %21 = arith.mulf %19, %20 : vector<4x256xf32>
    %22 = arith.addf %16, %21 : vector<4x256xf32>
    %23 = vector.extract_strided_slice %0 {offsets = [0, 3], sizes = [4, 1], strides = [1, 1]} : vector<4x4xf32> to vector<4x1xf32>
    %24 = vector.extract_strided_slice %3 {offsets = [3, 0], sizes = [1, 256], strides = [1, 1]} : vector<4x256xf32> to vector<1x256xf32>
    %25 = vector.broadcast %23 : vector<4x1xf32> to vector<4x256xf32>
    %26 = vector.broadcast %24 : vector<1x256xf32> to vector<4x256xf32>
    %27 = arith.mulf %25, %26 : vector<4x256xf32>
    %28 = arith.addf %22, %27 : vector<4x256xf32>
    %29 = vector.broadcast %1 : vector<4x1xf32> to vector<4x256xf32>
    %30 = arith.addf %28, %29 : vector<4x256xf32>
    %c0_6 = arith.constant 0 : index
    %c0_7 = arith.constant 0 : index
    %c0_8 = arith.constant 0 : index
    %31 = vector.load %arg4[%c0_6, %c0_7, %c0_8] : memref<2x4x256xf32, #tpu.memory_space<vmem>>, vector<1x4x256xf32>
    %32 = vector.shape_cast %31 : vector<1x4x256xf32> to vector<4x256xf32>
    %33 = vector.shape_cast %30 : vector<4x256xf32> to vector<1x4x256xf32>
    tpu.vector_store %arg4[%c0_6, %c0_7, %c0_8], %33 {strides = array<i32>} : memref<2x4x256xf32, #tpu.memory_space<vmem>>, vector<1x4x256xf32>,
    %c1 = arith.constant 1 : index
    %c0_9 = arith.constant 0 : index
    %c0_10 = arith.constant 0 : index
    %34 = vector.load %arg1[%c1, %c0_9, %c0_10] : memref<2x4x256xf32, #tpu.memory_space<vmem>>, vector<1x4x256xf32>
    %35 = vector.shape_cast %34 : vector<1x4x256xf32> to vector<4x256xf32>
    %cst_11 = arith.constant 0.000000e+00 : f32
    %36 = vector.broadcast %cst_11 : f32 to vector<4x256xf32>
    %37 = vector.extract_strided_slice %0 {offsets = [0, 0], sizes = [4, 1], strides = [1, 1]} : vector<4x4xf32> to vector<4x1xf32>
    %38 = vector.extract_strided_slice %35 {offsets = [0, 0], sizes = [1, 256], strides = [1, 1]} : vector<4x256xf32> to vector<1x256xf32>
    %39 = vector.broadcast %37 : vector<4x1xf32> to vector<4x256xf32>
    %40 = vector.broadcast %38 : vector<1x256xf32> to vector<4x256xf32>
    %41 = arith.mulf %39, %40 : vector<4x256xf32>
    %42 = arith.addf %36, %41 : vector<4x256xf32>
    %43 = vector.extract_strided_slice %0 {offsets = [0, 1], sizes = [4, 1], strides = [1, 1]} : vector<4x4xf32> to vector<4x1xf32>
    %44 = vector.extract_strided_slice %35 {offsets = [1, 0], sizes = [1, 256], strides = [1, 1]} : vector<4x256xf32> to vector<1x256xf32>
    %45 = vector.broadcast %43 : vector<4x1xf32> to vector<4x256xf32>
    %46 = vector.broadcast %44 : vector<1x256xf32> to vector<4x256xf32>
    %47 = arith.mulf %45, %46 : vector<4x256xf32>
    %48 = arith.addf %42, %47 : vector<4x256xf32>
    %49 = vector.extract_strided_slice %0 {offsets = [0, 2], sizes = [4, 1], strides = [1, 1]} : vector<4x4xf32> to vector<4x1xf32>
    %50 = vector.extract_strided_slice %35 {offsets = [2, 0], sizes = [1, 256], strides = [1, 1]} : vector<4x256xf32> to vector<1x256xf32>
    %51 = vector.broadcast %49 : vector<4x1xf32> to vector<4x256xf32>
    %52 = vector.broadcast %50 : vector<1x256xf32> to vector<4x256xf32>
    %53 = arith.mulf %51, %52 : vector<4x256xf32>
    %54 = arith.addf %48, %53 : vector<4x256xf32>
    %55 = vector.extract_strided_slice %0 {offsets = [0, 3], sizes = [4, 1], strides = [1, 1]} : vector<4x4xf32> to vector<4x1xf32>
    %56 = vector.extract_strided_slice %35 {offsets = [3, 0], sizes = [1, 256], strides = [1, 1]} : vector<4x256xf32> to vector<1x256xf32>
    %57 = vector.broadcast %55 : vector<4x1xf32> to vector<4x256xf32>
    %58 = vector.broadcast %56 : vector<1x256xf32> to vector<4x256xf32>
    %59 = arith.mulf %57, %58 : vector<4x256xf32>
    %60 = arith.addf %54, %59 : vector<4x256xf32>
    %61 = vector.broadcast %1 : vector<4x1xf32> to vector<4x256xf32>
    %62 = arith.addf %60, %61 : vector<4x256xf32>
    %c1_12 = arith.constant 1 : index
    %c0_13 = arith.constant 0 : index
    %c0_14 = arith.constant 0 : index
    %63 = vector.load %arg4[%c1_12, %c0_13, %c0_14] : memref<2x4x256xf32, #tpu.memory_space<vmem>>, vector<1x4x256xf32>
    %64 = vector.shape_cast %63 : vector<1x4x256xf32> to vector<4x256xf32>
    %65 = vector.shape_cast %62 : vector<4x256xf32> to vector<1x4x256xf32>
    tpu.vector_store %arg4[%c1_12, %c0_13, %c0_14], %65 {strides = array<i32>} : memref<2x4x256xf32, #tpu.memory_space<vmem>>, vector<1x4x256xf32>,
    return
  }
  func.func @transform_0(%arg0: i32) -> (i32, i32, i32) {
    %c0_i32 = arith.constant 0 : i32
    %c0_i32_0 = arith.constant 0 : i32
    %c0_i32_1 = arith.constant 0 : i32
    return %arg0, %c0_i32, %c0_i32_0 : i32, i32, i32
  }
  func.func @transform_1(%arg0: i32) -> (i32, i32) {
    %c0_i32 = arith.constant 0 : i32
    %c0_i32_0 = arith.constant 0 : i32
    %c0_i32_1 = arith.constant 0 : i32
    return %c0_i32, %c0_i32_0 : i32, i32
  }
  func.func @transform_2(%arg0: i32) -> (i32, i32) {
    %c0_i32 = arith.constant 0 : i32
    %c0_i32_0 = arith.constant 0 : i32
    %c0_i32_1 = arith.constant 0 : i32
    return %c0_i32, %c0_i32_0 : i32, i32
  }
  func.func @transform_3(%arg0: i32) -> (i32, i32, i32) {
    %c0_i32 = arith.constant 0 : i32
    %c0_i32_0 = arith.constant 0 : i32
    %c0_i32_1 = arith.constant 0 : i32
    return %arg0, %c0_i32, %c0_i32_0 : i32, i32, i32
  }
}

</mosaic_0001>

<bundles_post_ra>
// kernel: conv1x1_nchw.1
= control target key start
LH: loop header
LB: loop body
LE: loop exit
PB: predicated region body
PF: predicated region fallthrough
CT: control target
= control target key end

     0   :  { %v250_v0 = vmov 0   ;;  %v251_v2 = vmov 2   ;;  %v252_v3 = vmov 1   ;;  %v253_v4 = vmov 3   ;;  %s292_s1 = inlined_call_operand.vmem [shape: f32[4,4], index: 1, kind: input, shape index: {}]   ;;  %s293_s2 = inlined_call_operand.vmem [shape: f32[4,1], index: 2, kind: input, shape index: {}]   ;;  %s294_s0 = inlined_call_operand.vmem [shape: f32[2,4,256], index: 0, kind: input, shape index: {}]   ;;  %s295_s3 = inlined_call_operand.vmem [shape: f32[2,4,256], index: 3, kind: output, shape index: {}]  }
   0x1   :  { %244 = vset.pattern.permute.xlu0 %v250_v0  ;;  %v14_v1 = vld [vmem:[%s292_s1] sm:$0xf]  ;;  %246 = vset.pattern.permute.xlu1 %v251_v2  ;;  %v23_v6 = vlaneseq  ;;  %v238_v11 = vld [vmem:[%s294_s0 + $0x8] sm:$0xff] }
   0x2   :  { %19 = vperm.xlu0 %244, %v14_v1   ;;  %72 = vperm.xlu1 %246, %v14_v1   ;;  %v15_v5 = vld [vmem:[%s293_s2] sm:$0xf] }
   0x3   :  { %v24_v7 = vshrl.u32 %v23_v6, 7  ;;  %v16_v10 = vld [vmem:[%s294_s0] sm:$0xff] }
   0x5   :  { %v25_v8 = vsub.s32 0, %v24_v7  ;;  %v29_v9 = vsub.s32 4, %v24_v7  ;;  %v77_v12 = vsub.s32 2, %v24_v7  ;;  %v81_v13 = vsub.s32 6, %v24_v7 }
   0x6   :  { %245 = vset.pattern.permute.xlu0 %v252_v3  ;;  %247 = vset.pattern.permute.xlu1 %v253_v4  ;;  %v51_v14 = vsub.s32 1, %v24_v7  ;;  %v55_v15 = vsub.s32 5, %v24_v7  ;;  %v103_v16 = vsub.s32 3, %v24_v7  ;;  %v107_v17 = vsub.s32 7, %v24_v7 }
   0x7   :  { %46 = vperm.xlu0 %245, %v14_v1   ;;  %98 = vperm.xlu1 %247, %v14_v1   ;;  %v26_v18 = vrot.slane %v16_v10, %v25_v8  ;;  %v30_v19 = vrot.slane %v16_v10, %v29_v9  ;;  %v141_v20 = vrot.slane %v238_v11, %v25_v8 }
   0x8   :  { %v145_v21 = vrot.slane %v238_v11, %v29_v9  ;;  %v78_v22 = vrot.slane %v16_v10, %v77_v12  ;;  %v82_v23 = vrot.slane %v16_v10, %v81_v13  ;;  %v185_v24 = vrot.slane %v238_v11, %v77_v12 }
   0x9   :  { %v189_v25 = vrot.slane %v238_v11, %v81_v13  ;;  %v52_v26 = vrot.slane %v16_v10, %v51_v14  ;;  %v56_v27 = vrot.slane %v16_v10, %v55_v15  ;;  %v163_v28 = vrot.slane %v238_v11, %v51_v14 }
   0xa   :  { %v167_v29 = vrot.slane %v238_v11, %v55_v15  ;;  %v104_v30 = vrot.slane %v16_v10, %v103_v16  ;;  %v108_v31 = vrot.slane %v16_v10, %v107_v17  ;;  %v207_v32 = vrot.slane %v238_v11, %v103_v16 }
   0xb   :  { %248 = vset.pattern.permute.xlu1 %v250_v0  ;;  %249 = vset.pattern.permute.xlu0 %v250_v0  ;;  %v211_v33 = vrot.slane %v238_v11, %v107_v17  ;;  %v36_v35 = vrot.slane %v26_v18, %v25_v8  ;;  %v40_v36 = vrot.slane %v30_v19, %v25_v8 }
   0xc   :  { %125 = vperm.xlu1 %248, %v15_v5   ;;  %v151_v37 = vrot.slane %v141_v20, %v25_v8  ;;  %v155_v38 = vrot.slane %v145_v21, %v25_v8  ;;  %v88_v40 = vrot.slane %v78_v22, %v77_v12  ;;  %v92_v41 = vrot.slane %v82_v23, %v77_v12 }
   0xd   :  { %v195_v42 = vrot.slane %v185_v24, %v77_v12  ;;  %v199_v43 = vrot.slane %v189_v25, %v77_v12  ;;  %v62_v44 = vrot.slane %v52_v26, %v51_v14  ;;  %v66_v45 = vrot.slane %v56_v27, %v51_v14 }
   0xe   :  { %v173_v46 = vrot.slane %v163_v28, %v51_v14  ;;  %v177_v47 = vrot.slane %v167_v29, %v51_v14  ;;  %v114_v48 = vrot.slane %v104_v30, %v103_v16  ;;  %v118_v49 = vrot.slane %v108_v31, %v103_v16 }
   0xf   :  { %v217_v50 = vrot.slane %v207_v32, %v103_v16  ;;  %v221_v51 = vrot.slane %v211_v33, %v103_v16 }
  0x7d   :  { %v20_v34 = vpop.permute.xlu0 %19  ;;  %v73_v39 = vpop.permute.xlu1 %72 }
  0x7e   :  { %v41_v52 = vmul.f32 %v36_v35, %v20_v34  ;;  %v42_v53 = vmul.f32 %v40_v36, %v20_v34  ;;  %v156_v54 = vmul.f32 %v151_v37, %v20_v34  ;;  %v157_v55 = vmul.f32 %v155_v38, %v20_v34 }
  0x7f   :  { %v93_v56 = vmul.f32 %v88_v40, %v73_v39  ;;  %v94_v57 = vmul.f32 %v92_v41, %v73_v39  ;;  %v200_v58 = vmul.f32 %v195_v42, %v73_v39  ;;  %v201_v59 = vmul.f32 %v199_v43, %v73_v39 }
  0x82   :  { %v47_v60 = vpop.permute.xlu0 %46  ;;  %v99_v61 = vpop.permute.xlu1 %98 }
  0x83   :  { %v67_v62 = vmul.f32 %v62_v44, %v47_v60  ;;  %v68_v63 = vmul.f32 %v66_v45, %v47_v60  ;;  %v178_v0 = vmul.f32 %v173_v46, %v47_v60  ;;  %v179_v1 = vmul.f32 %v177_v47, %v47_v60 }
  0x84   :  { %v119_v2 = vmul.f32 %v114_v48, %v99_v61  ;;  %v120_v3 = vmul.f32 %v118_v49, %v99_v61  ;;  %v222_v4 = vmul.f32 %v217_v50, %v99_v61  ;;  %v223_v5 = vmul.f32 %v221_v51, %v99_v61 }
  0x85   :  { %v69_v6 = vadd.f32 %v67_v62, %v41_v52  ;;  %v70_v7 = vadd.f32 %v68_v63, %v42_v53  ;;  %v180_v8 = vadd.f32 %v178_v0, %v156_v54  ;;  %v181_v9 = vadd.f32 %v179_v1, %v157_v55 }
  0x87   :  { %v95_v10 = vadd.f32 %v93_v56, %v69_v6  ;;  %v96_v11 = vadd.f32 %v94_v57, %v70_v7  ;;  %v202_v12 = vadd.f32 %v200_v58, %v180_v8  ;;  %v203_v13 = vadd.f32 %v201_v59, %v181_v9  ;;  %v126_v14 = vpop.permute.xlu1 %125 }
  0x89   :  { %v121_v15 = vadd.f32 %v119_v2, %v95_v10  ;;  %v122_v16 = vadd.f32 %v120_v3, %v96_v11  ;;  %v224_v17 = vadd.f32 %v222_v4, %v202_v12  ;;  %v225_v18 = vadd.f32 %v223_v5, %v203_v13 }
  0x8b   :  { %v128_v19 = vadd.f32 %v126_v14, %v121_v15  ;;  %v129_v20 = vadd.f32 %v126_v14, %v122_v16  ;;  %v226_v21 = vadd.f32 %v224_v17, %v126_v14  ;;  %v227_v22 = vadd.f32 %v225_v18, %v126_v14 }
  0x8d   :  { %v132_v23 = vcombine.low %v128_v19, %v129_v20  ;;  %v230_v24 = vcombine.low %v226_v21, %v227_v22 }
  0x8f   :  { %134 = vst [vmem:[%s295_s3] sm:$0xff] %v132_v23  ;;  %239 = vst [vmem:[%s295_s3 + $0x8] sm:$0xff] %v230_v24 }

</bundles_post_ra>
